<compile_context>
chip_gen: v6e
topology: v6e:2x2x1
jax: 0.10.0
libtpu: 0.0.40
codegen_flags: <defaults>
</compile_context>

<pallas_src>
import numpy as np
import jax
import jax.numpy as jnp
from jax import lax
from jax.experimental import pallas as pl
from jax.experimental.pallas import tpu as pltpu

EPS = 1e-6
LANES = 128
MAX_ROWS_PER_TILE = 512   # 512 rows x 128 lanes = 65536 edges / tile (3 MiB block)
NUM_CORE_BLOCKS = 2       # leading "parallel" grid axis (megacore split on v7x)


# ---------------------------------------------------------------------------
# __init__ logic: build interior-edge index lists from faces (host-side numpy)
# ---------------------------------------------------------------------------
def build_edge_indices(faces):
    faces = np.asarray(faces, dtype=np.int32)
    vertices = list(set([tuple(v) for v in np.sort(
        np.concatenate((faces[:, 0:2], faces[:, 1:3]), axis=0))]))
    vert_face = {}
    for k, v in enumerate(faces):
        for vx in v:
            vx = int(vx)
            if vx not in vert_face:
                vert_face[vx] = [k]
            else:
                vert_face[vx].append(k)
    v0s = np.array([v[0] for v in vertices], 'int32')
    v1s = np.array([v[1] for v in vertices], 'int32')
    v2s, v3s = [], []
    idx = 0
    nosin_list = []
    for v0, v1 in zip(v0s, v1s):
        count = 0
        shared = sorted(list(set(vert_face[int(v0)]) & set(vert_face[int(v1)])))
        if len(shared) > 2:
            continue
        if len(shared) == 2:
            nosin_list.append(idx)
        for faceid in shared:
            face = faces[faceid]
            if v0 in face and v1 in face:
                v = np.copy(face)
                v = v[v != v0]
                v = v[v != v1]
                if count == 0:
                    v2s.append(int(v[0]))
                    count += 1
                else:
                    v3s.append(int(v[0]))
        idx += 1
    v2s = np.array(v2s, 'int32')
    v3s = np.array(v3s, 'int32')
    v0s = v0s[nosin_list]
    v1s = v1s[nosin_list]
    v2s = v2s[nosin_list]
    return v0s, v1s, v2s, v3s


# ---------------------------------------------------------------------------
# Pallas kernel: per-edge flattening loss contribution + reduction
# ---------------------------------------------------------------------------
def flatten_loss_kernel(n_ref, x_ref, out_ref, acc_ref):
    c = pl.program_id(0)           # core-block axis ("parallel")
    i = pl.program_id(1)           # edge-tile axis ("arbitrary")
    n_inner = pl.num_programs(1)

    @pl.when(i == 0)
    def _init():
        acc_ref[...] = jnp.zeros_like(acc_ref)

    # 12 dense coordinate planes, each (rows, 128) fully-packed f32.
    v0x = x_ref[0];  v0y = x_ref[1];  v0z = x_ref[2]
    v1x = x_ref[3];  v1y = x_ref[4];  v1z = x_ref[5]
    v2x = x_ref[6];  v2y = x_ref[7];  v2z = x_ref[8]
    v3x = x_ref[9];  v3y = x_ref[10]; v3z = x_ref[11]

    # a2 == a1 in the reference (v1 - v0 twice)
    a1x = v1x - v0x; a1y = v1y - v0y; a1z = v1z - v0z
    b1x = v2x - v0x; b1y = v2y - v0y; b1z = v2z - v0z
    b2x = v3x - v0x; b2y = v3y - v0y; b2z = v3z - v0z

    a1l2 = a1x * a1x + a1y * a1y + a1z * a1z
    b1l2 = b1x * b1x + b1y * b1y + b1z * b1z
    b2l2 = b2x * b2x + b2y * b2y + b2z * b2z
    ab1 = a1x * b1x + a1y * b1y + a1z * b1z
    ab2 = a1x * b2x + a1y * b2y + a1z * b2z

    sa = a1l2 + EPS
    sb1 = b1l2 + EPS
    sb2 = b2l2 + EPS

    # a1l1*b1l1 == sqrt((a1l2+eps)*(b1l2+eps)): one sqrt instead of two
    cos1 = ab1 / (jnp.sqrt(sa * sb1) + EPS)
    cos2 = ab2 / (jnp.sqrt(sa * sb2) + EPS)
    s1 = 1.0 - cos1 * cos1 + EPS    # sin1^2
    s2 = 1.0 - cos2 * cos2 + EPS    # sin2^2

    inv_a1l2 = 1.0 / sa             # shared by c1 and c2
    t1 = ab1 * inv_a1l2
    t2 = ab2 * inv_a1l2
    cb1x = b1x - a1x * t1; cb1y = b1y - a1y * t1; cb1z = b1z - a1z * t1
    cb2x = b2x - a1x * t2; cb2y = b2y - a1y * t2; cb2z = b2z - a1z * t2
    cbdot = cb1x * cb2x + cb1y * cb2y + cb1z * cb2z

    # cb1l1*cb2l1 == sqrt((b1l2+eps)*sin1^2*(b2l2+eps)*sin2^2): one sqrt
    cosd = cbdot / (jnp.sqrt(sb1 * s1 * sb2 * s2) + EPS)
    contrib = (cosd + 1.0) * (cosd + 1.0)          # (rows, 128)

    # Padded-lane handling.  Only the boundary tile (and any fully-padded
    # trailing tile) pays for the iota/compare/select; interior tiles take
    # the unmasked fast path.
    rows = acc_ref.shape[0]
    tile_elems = rows * LANES
    base = (c * n_inner + i) * tile_elems
    rem = n_ref[0] - base          # valid edges remaining at this tile start

    @pl.when(rem >= tile_elems)
    def _full():
        acc_ref[...] += contrib

    @pl.when(rem < tile_elems)
    def _partial():
        row_id = lax.broadcasted_iota(jnp.int32, (rows, LANES), 0)
        lane_id = lax.broadcasted_iota(jnp.int32, (rows, LANES), 1)
        local_id = row_id * LANES + lane_id
        acc_ref[...] += jnp.where(local_id < rem, contrib, 0.0)

    @pl.when(i == n_inner - 1)
    def _finalize():
        out_ref[...] = jnp.sum(acc_ref[...]).reshape(1, 1, 1)


# ---------------------------------------------------------------------------
# Wrapper
# ---------------------------------------------------------------------------
def _tiling(num_edges):
    rows_needed = max(1, -(-num_edges // LANES))
    # Use 2 core blocks only when there is enough work to split.
    ncb = NUM_CORE_BLOCKS if rows_needed > 8 else 1
    rows_per_core = -(-rows_needed // ncb)
    rows_per_tile = min(MAX_ROWS_PER_TILE, ((rows_per_core + 7) // 8) * 8)
    inner = -(-rows_per_core // rows_per_tile)
    tiles = inner * ncb
    e_pad = tiles * rows_per_tile * LANES
    return rows_per_tile, inner, ncb, e_pad


def flatten_loss_pallas(vertices, v0s, v1s, v2s, v3s, average=False):
    """vertices: (V, 3) float. Returns loss of shape (1,) (batch of 1), like
    the PyTorch module with average=False, or a scalar if average=True."""
    num_edges = int(np.asarray(v0s).shape[0])
    batch_size = 1
    if num_edges == 0:
        loss = jnp.zeros((1,), jnp.float32)
        return loss.sum() / batch_size if average else loss

    rows_per_tile, inner, ncb, e_pad = _tiling(num_edges)

    # Single fused gather on concatenated indices, then one relayout to the
    # kernel-facing dense (12, rows, 128) coordinate-plane layout.
    idx = jnp.concatenate([
        jnp.asarray(v0s, jnp.int32), jnp.asarray(v1s, jnp.int32),
        jnp.asarray(v2s, jnp.int32), jnp.asarray(v3s, jnp.int32)])
    g = jnp.take(vertices.astype(jnp.float32), idx, axis=0)          # (4E, 3)
    g = g.reshape(4, num_edges, 3).transpose(0, 2, 1).reshape(12, num_edges)
    g = jnp.pad(g, ((0, 0), (0, e_pad - num_edges)))
    packed = g.reshape(12, e_pad // LANES, LANES)                    # (12, rows, 128)

    n_arr = jnp.array([num_edges], jnp.int32)                        # scalar prefetch

    in_spec = pl.BlockSpec((12, rows_per_tile, LANES),
                           lambda c, i, n: (0, c * inner + i, 0))
    out_spec = pl.BlockSpec((1, 1, 1), lambda c, i, n: (c, 0, 0))

    out = pl.pallas_call(
        flatten_loss_kernel,
        out_shape=jax.ShapeDtypeStruct((ncb, 1, 1), jnp.float32),
        grid_spec=pltpu.PrefetchScalarGridSpec(
            num_scalar_prefetch=1,
            grid=(ncb, inner),
            in_specs=[in_spec],
            out_specs=out_spec,
            scratch_shapes=[pltpu.VMEM((rows_per_tile, LANES), jnp.float32)]),
        compiler_params=pltpu.CompilerParams(
            dimension_semantics=("parallel", "arbitrary")),
    )(n_arr, packed)

    loss = jnp.sum(out).reshape((1,))    # batch dim from the unsqueeze(0)
    if average:
        return loss.sum() / batch_size
    return loss


# ---------------------------------------------------------------------------
# Pure numpy reference of the forward pass (for verification)
# ---------------------------------------------------------------------------
def flatten_loss_ref(vertices, v0s, v1s, v2s, v3s, eps=1e-6):
    V = np.asarray(vertices, np.float32)[None]        # (1, V, 3)
    v0 = V[:, v0s]; v1 = V[:, v1s]; v2 = V[:, v2s]; v3 = V[:, v3s]
    a1 = v1 - v0; b1 = v2 - v0
    a1l2 = (a1 ** 2).sum(-1); b1l2 = (b1 ** 2).sum(-1)
    a1l1 = np.sqrt(a1l2 + eps); b1l1 = np.sqrt(b1l2 + eps)
    ab1 = (a1 * b1).sum(-1)
    cos1 = ab1 / (a1l1 * b1l1 + eps)
    sin1 = np.sqrt(1 - cos1 ** 2 + eps)
    c1 = a1 * (ab1 / (a1l2 + eps))[:, :, None]
    cb1 = b1 - c1; cb1l1 = b1l1 * sin1
    a2 = v1 - v0; b2 = v3 - v0
    a2l2 = (a2 ** 2).sum(-1); b2l2 = (b2 ** 2).sum(-1)
    a2l1 = np.sqrt(a2l2 + eps); b2l1 = np.sqrt(b2l2 + eps)
    ab2 = (a2 * b2).sum(-1)
    cos2 = ab2 / (a2l1 * b2l1 + eps)
    sin2 = np.sqrt(1 - cos2 ** 2 + eps)
    c2 = a2 * (ab2 / (a2l2 + eps))[:, :, None]
    cb2 = b2 - c2; cb2l1 = b2l1 * sin2
    cos = (cb1 * cb2).sum(-1) / (cb1l1 * cb2l1 + eps)
    return ((cos + 1) ** 2).sum(axis=1)               # (1,)


if __name__ == "__main__":
    # Small triangulated 6x6 grid mesh: 36 vertices, 50 faces, 65 interior edges.
    n = 6
    faces = []
    for r in range(n - 1):
        for c in range(n - 1):
            i00 = r * n + c
            i01 = i00 + 1
            i10 = i00 + n
            i11 = i10 + 1
            faces.append([i00, i10, i01])
            faces.append([i01, i10, i11])
    faces = np.array(faces, np.int32)

    v0s, v1s, v2s, v3s = build_edge_indices(faces)

    key = jax.random.PRNGKey(0)
    verts = jax.random.normal(key, (n * n, 3), dtype=jnp.float32)

    loss = flatten_loss_pallas(verts, v0s, v1s, v2s, v3s, average=False)
    loss = jax.block_until_ready(loss)

    ref = flatten_loss_ref(np.asarray(verts), v0s, v1s, v2s, v3s)
    np.testing.assert_allclose(np.asarray(loss), ref, rtol=2e-4, atol=2e-4)

    print("KERNEL_OK")
</pallas_src>

<mosaic_0001>
module attributes {stable_mosaic.version = 11 : i64} {
  func.func @flatten_loss_kernel(%arg0: i32, %arg1: i32, %arg2: memref<1xi32, #tpu.memory_space<smem>>, %arg3: memref<12x8x128xf32, #tpu.memory_space<vmem>>, %arg4: memref<1x1x1xf32, #tpu.memory_space<vmem>>, %arg5: memref<8x128xf32, #tpu.memory_space<vmem>>) attributes {dimension_semantics = [#tpu.dimension_semantics<parallel>, #tpu.dimension_semantics<arbitrary>], iteration_bounds = array<i64: 1, 1>, scalar_prefetch = 1 : i64, scratch_operands = 1 : i64, tpu.core_type = #tpu.core_type<tc>, window_params = [{transform_indices = @transform_0, window_bounds = array<i64: 12, 8, 128>}, {transform_indices = @transform_1, window_bounds = array<i64: 1, 1, 1>}]} {
    %c0_i32 = arith.constant 0 : i32
    %0 = arith.cmpi eq, %arg1, %c0_i32 : i32
    %1 = arith.extui %0 : i1 to i32
    %c0_i32_0 = arith.constant 0 : i32
    %2 = arith.cmpi ne, %1, %c0_i32_0 : i32
    scf.if %2 {
      %cst_44 = arith.constant 0.000000e+00 : f32
      %134 = vector.broadcast %cst_44 : f32 to vector<8x128xf32>
      %c0_45 = arith.constant 0 : index
      %c0_46 = arith.constant 0 : index
      %135 = vector.load %arg5[%c0_45, %c0_46] : memref<8x128xf32, #tpu.memory_space<vmem>>, vector<8x128xf32>
      tpu.vector_store %arg5[%c0_45, %c0_46], %134 {strides = array<i32>} : memref<8x128xf32, #tpu.memory_space<vmem>>, vector<8x128xf32>,
    } else {
    }
    %c0 = arith.constant 0 : index
    %c0_1 = arith.constant 0 : index
    %c0_2 = arith.constant 0 : index
    %3 = vector.load %arg3[%c0, %c0_1, %c0_2] : memref<12x8x128xf32, #tpu.memory_space<vmem>>, vector<1x8x128xf32>
    %4 = vector.shape_cast %3 : vector<1x8x128xf32> to vector<8x128xf32>
    %c1 = arith.constant 1 : index
    %c0_3 = arith.constant 0 : index
    %c0_4 = arith.constant 0 : index
    %5 = vector.load %arg3[%c1, %c0_3, %c0_4] : memref<12x8x128xf32, #tpu.memory_space<vmem>>, vector<1x8x128xf32>
    %6 = vector.shape_cast %5 : vector<1x8x128xf32> to vector<8x128xf32>
    %c2 = arith.constant 2 : index
    %c0_5 = arith.constant 0 : index
    %c0_6 = arith.constant 0 : index
    %7 = vector.load %arg3[%c2, %c0_5, %c0_6] : memref<12x8x128xf32, #tpu.memory_space<vmem>>, vector<1x8x128xf32>
    %8 = vector.shape_cast %7 : vector<1x8x128xf32> to vector<8x128xf32>
    %c3 = arith.constant 3 : index
    %c0_7 = arith.constant 0 : index
    %c0_8 = arith.constant 0 : index
    %9 = vector.load %arg3[%c3, %c0_7, %c0_8] : memref<12x8x128xf32, #tpu.memory_space<vmem>>, vector<1x8x128xf32>
    %10 = vector.shape_cast %9 : vector<1x8x128xf32> to vector<8x128xf32>
    %c4 = arith.constant 4 : index
    %c0_9 = arith.constant 0 : index
    %c0_10 = arith.constant 0 : index
    %11 = vector.load %arg3[%c4, %c0_9, %c0_10] : memref<12x8x128xf32, #tpu.memory_space<vmem>>, vector<1x8x128xf32>
    %12 = vector.shape_cast %11 : vector<1x8x128xf32> to vector<8x128xf32>
    %c5 = arith.constant 5 : index
    %c0_11 = arith.constant 0 : index
    %c0_12 = arith.constant 0 : index
    %13 = vector.load %arg3[%c5, %c0_11, %c0_12] : memref<12x8x128xf32, #tpu.memory_space<vmem>>, vector<1x8x128xf32>
    %14 = vector.shape_cast %13 : vector<1x8x128xf32> to vector<8x128xf32>
    %c6 = arith.constant 6 : index
    %c0_13 = arith.constant 0 : index
    %c0_14 = arith.constant 0 : index
    %15 = vector.load %arg3[%c6, %c0_13, %c0_14] : memref<12x8x128xf32, #tpu.memory_space<vmem>>, vector<1x8x128xf32>
    %16 = vector.shape_cast %15 : vector<1x8x128xf32> to vector<8x128xf32>
    %c7 = arith.constant 7 : index
    %c0_15 = arith.constant 0 : index
    %c0_16 = arith.constant 0 : index
    %17 = vector.load %arg3[%c7, %c0_15, %c0_16] : memref<12x8x128xf32, #tpu.memory_space<vmem>>, vector<1x8x128xf32>
    %18 = vector.shape_cast %17 : vector<1x8x128xf32> to vector<8x128xf32>
    %c8 = arith.constant 8 : index
    %c0_17 = arith.constant 0 : index
    %c0_18 = arith.constant 0 : index
    %19 = vector.load %arg3[%c8, %c0_17, %c0_18] : memref<12x8x128xf32, #tpu.memory_space<vmem>>, vector<1x8x128xf32>
    %20 = vector.shape_cast %19 : vector<1x8x128xf32> to vector<8x128xf32>
    %c9 = arith.constant 9 : index
    %c0_19 = arith.constant 0 : index
    %c0_20 = arith.constant 0 : index
    %21 = vector.load %arg3[%c9, %c0_19, %c0_20] : memref<12x8x128xf32, #tpu.memory_space<vmem>>, vector<1x8x128xf32>
    %22 = vector.shape_cast %21 : vector<1x8x128xf32> to vector<8x128xf32>
    %c10 = arith.constant 10 : index
    %c0_21 = arith.constant 0 : index
    %c0_22 = arith.constant 0 : index
    %23 = vector.load %arg3[%c10, %c0_21, %c0_22] : memref<12x8x128xf32, #tpu.memory_space<vmem>>, vector<1x8x128xf32>
    %24 = vector.shape_cast %23 : vector<1x8x128xf32> to vector<8x128xf32>
    %c11 = arith.constant 11 : index
    %c0_23 = arith.constant 0 : index
    %c0_24 = arith.constant 0 : index
    %25 = vector.load %arg3[%c11, %c0_23, %c0_24] : memref<12x8x128xf32, #tpu.memory_space<vmem>>, vector<1x8x128xf32>
    %26 = vector.shape_cast %25 : vector<1x8x128xf32> to vector<8x128xf32>
    %27 = arith.subf %10, %4 : vector<8x128xf32>
    %28 = arith.subf %12, %6 : vector<8x128xf32>
    %29 = arith.subf %14, %8 : vector<8x128xf32>
    %30 = arith.subf %16, %4 : vector<8x128xf32>
    %31 = arith.subf %18, %6 : vector<8x128xf32>
    %32 = arith.subf %20, %8 : vector<8x128xf32>
    %33 = arith.subf %22, %4 : vector<8x128xf32>
    %34 = arith.subf %24, %6 : vector<8x128xf32>
    %35 = arith.subf %26, %8 : vector<8x128xf32>
    %36 = arith.mulf %27, %27 : vector<8x128xf32>
    %37 = arith.mulf %28, %28 : vector<8x128xf32>
    %38 = arith.addf %36, %37 : vector<8x128xf32>
    %39 = arith.mulf %29, %29 : vector<8x128xf32>
    %40 = arith.addf %38, %39 : vector<8x128xf32>
    %41 = arith.mulf %30, %30 : vector<8x128xf32>
    %42 = arith.mulf %31, %31 : vector<8x128xf32>
    %43 = arith.addf %41, %42 : vector<8x128xf32>
    %44 = arith.mulf %32, %32 : vector<8x128xf32>
    %45 = arith.addf %43, %44 : vector<8x128xf32>
    %46 = arith.mulf %33, %33 : vector<8x128xf32>
    %47 = arith.mulf %34, %34 : vector<8x128xf32>
    %48 = arith.addf %46, %47 : vector<8x128xf32>
    %49 = arith.mulf %35, %35 : vector<8x128xf32>
    %50 = arith.addf %48, %49 : vector<8x128xf32>
    %51 = arith.mulf %27, %30 : vector<8x128xf32>
    %52 = arith.mulf %28, %31 : vector<8x128xf32>
    %53 = arith.addf %51, %52 : vector<8x128xf32>
    %54 = arith.mulf %29, %32 : vector<8x128xf32>
    %55 = arith.addf %53, %54 : vector<8x128xf32>
    %56 = arith.mulf %27, %33 : vector<8x128xf32>
    %57 = arith.mulf %28, %34 : vector<8x128xf32>
    %58 = arith.addf %56, %57 : vector<8x128xf32>
    %59 = arith.mulf %29, %35 : vector<8x128xf32>
    %60 = arith.addf %58, %59 : vector<8x128xf32>
    %cst = arith.constant 9.99999997E-7 : f32
    %61 = vector.broadcast %cst : f32 to vector<8x128xf32>
    %62 = arith.addf %40, %61 : vector<8x128xf32>
    %cst_25 = arith.constant 9.99999997E-7 : f32
    %63 = vector.broadcast %cst_25 : f32 to vector<8x128xf32>
    %64 = arith.addf %45, %63 : vector<8x128xf32>
    %cst_26 = arith.constant 9.99999997E-7 : f32
    %65 = vector.broadcast %cst_26 : f32 to vector<8x128xf32>
    %66 = arith.addf %50, %65 : vector<8x128xf32>
    %67 = arith.mulf %62, %64 : vector<8x128xf32>
    %68 = math.sqrt %67 : vector<8x128xf32>
    %cst_27 = arith.constant 9.99999997E-7 : f32
    %69 = vector.broadcast %cst_27 : f32 to vector<8x128xf32>
    %70 = arith.addf %68, %69 : vector<8x128xf32>
    %71 = arith.divf %55, %70 : vector<8x128xf32>
    %72 = arith.mulf %62, %66 : vector<8x128xf32>
    %73 = math.sqrt %72 : vector<8x128xf32>
    %cst_28 = arith.constant 9.99999997E-7 : f32
    %74 = vector.broadcast %cst_28 : f32 to vector<8x128xf32>
    %75 = arith.addf %73, %74 : vector<8x128xf32>
    %76 = arith.divf %60, %75 : vector<8x128xf32>
    %77 = arith.mulf %71, %71 : vector<8x128xf32>
    %cst_29 = arith.constant 1.000000e+00 : f32
    %78 = vector.broadcast %cst_29 : f32 to vector<8x128xf32>
    %79 = arith.subf %78, %77 : vector<8x128xf32>
    %cst_30 = arith.constant 9.99999997E-7 : f32
    %80 = vector.broadcast %cst_30 : f32 to vector<8x128xf32>
    %81 = arith.addf %79, %80 : vector<8x128xf32>
    %82 = arith.mulf %76, %76 : vector<8x128xf32>
    %cst_31 = arith.constant 1.000000e+00 : f32
    %83 = vector.broadcast %cst_31 : f32 to vector<8x128xf32>
    %84 = arith.subf %83, %82 : vector<8x128xf32>
    %cst_32 = arith.constant 9.99999997E-7 : f32
    %85 = vector.broadcast %cst_32 : f32 to vector<8x128xf32>
    %86 = arith.addf %84, %85 : vector<8x128xf32>
    %cst_33 = arith.constant 1.000000e+00 : f32
    %87 = vector.broadcast %cst_33 : f32 to vector<8x128xf32>
    %88 = arith.divf %87, %62 : vector<8x128xf32>
    %89 = arith.mulf %55, %88 : vector<8x128xf32>
    %90 = arith.mulf %60, %88 : vector<8x128xf32>
    %91 = arith.mulf %27, %89 : vector<8x128xf32>
    %92 = arith.subf %30, %91 : vector<8x128xf32>
    %93 = arith.mulf %28, %89 : vector<8x128xf32>
    %94 = arith.subf %31, %93 : vector<8x128xf32>
    %95 = arith.mulf %29, %89 : vector<8x128xf32>
    %96 = arith.subf %32, %95 : vector<8x128xf32>
    %97 = arith.mulf %27, %90 : vector<8x128xf32>
    %98 = arith.subf %33, %97 : vector<8x128xf32>
    %99 = arith.mulf %28, %90 : vector<8x128xf32>
    %100 = arith.subf %34, %99 : vector<8x128xf32>
    %101 = arith.mulf %29, %90 : vector<8x128xf32>
    %102 = arith.subf %35, %101 : vector<8x128xf32>
    %103 = arith.mulf %92, %98 : vector<8x128xf32>
    %104 = arith.mulf %94, %100 : vector<8x128xf32>
    %105 = arith.addf %103, %104 : vector<8x128xf32>
    %106 = arith.mulf %96, %102 : vector<8x128xf32>
    %107 = arith.addf %105, %106 : vector<8x128xf32>
    %108 = arith.mulf %64, %81 : vector<8x128xf32>
    %109 = arith.mulf %108, %66 : vector<8x128xf32>
    %110 = arith.mulf %109, %86 : vector<8x128xf32>
    %111 = math.sqrt %110 : vector<8x128xf32>
    %cst_34 = arith.constant 9.99999997E-7 : f32
    %112 = vector.broadcast %cst_34 : f32 to vector<8x128xf32>
    %113 = arith.addf %111, %112 : vector<8x128xf32>
    %114 = arith.divf %107, %113 : vector<8x128xf32>
    %cst_35 = arith.constant 1.000000e+00 : f32
    %115 = vector.broadcast %cst_35 : f32 to vector<8x128xf32>
    %116 = arith.addf %114, %115 : vector<8x128xf32>
    %cst_36 = arith.constant 1.000000e+00 : f32
    %117 = vector.broadcast %cst_36 : f32 to vector<8x128xf32>
    %118 = arith.addf %114, %117 : vector<8x128xf32>
    %119 = arith.mulf %116, %118 : vector<8x128xf32>
    %c1_i32 = arith.constant 1 : i32
    %120 = arith.muli %arg0, %c1_i32 : i32
    %121 = arith.addi %120, %arg1 : i32
    %c1024_i32 = arith.constant 1024 : i32
    %122 = arith.muli %121, %c1024_i32 : i32
    %c0_37 = arith.constant 0 : index
    %123 = memref.load %arg2[%c0_37] : memref<1xi32, #tpu.memory_space<smem>>
    %124 = arith.subi %123, %122 : i32
    %c1024_i32_38 = arith.constant 1024 : i32
    %125 = arith.cmpi sge, %124, %c1024_i32_38 : i32
    %126 = arith.extui %125 : i1 to i32
    %c0_i32_39 = arith.constant 0 : i32
    %127 = arith.cmpi ne, %126, %c0_i32_39 : i32
    scf.if %127 {
      %c0_44 = arith.constant 0 : index
      %c0_45 = arith.constant 0 : index
      %134 = vector.load %arg5[%c0_44, %c0_45] : memref<8x128xf32, #tpu.memory_space<vmem>>, vector<8x128xf32>
      %135 = arith.addf %134, %119 : vector<8x128xf32>
      %c0_46 = arith.constant 0 : index
      %c0_47 = arith.constant 0 : index
      %136 = vector.load %arg5[%c0_46, %c0_47] : memref<8x128xf32, #tpu.memory_space<vmem>>, vector<8x128xf32>
      tpu.vector_store %arg5[%c0_46, %c0_47], %135 {strides = array<i32>} : memref<8x128xf32, #tpu.memory_space<vmem>>, vector<8x128xf32>,
    } else {
    }
    %c1024_i32_40 = arith.constant 1024 : i32
    %128 = arith.cmpi slt, %124, %c1024_i32_40 : i32
    %129 = arith.extui %128 : i1 to i32
    %c0_i32_41 = arith.constant 0 : i32
    %130 = arith.cmpi ne, %129, %c0_i32_41 : i32
    scf.if %130 {
      %134 = tpu.iota {dimensions = array<i32: 0>} : vector<8x128xi32>
      %135 = tpu.iota {dimensions = array<i32: 1>} : vector<8x128xi32>
      %c128_i32 = arith.constant 128 : i32
      %136 = vector.broadcast %c128_i32 : i32 to vector<8x128xi32>
      %137 = arith.muli %134, %136 : vector<8x128xi32>
      %138 = arith.addi %137, %135 : vector<8x128xi32>
      %c0_44 = arith.constant 0 : index
      %c0_45 = arith.constant 0 : index
      %139 = vector.load %arg5[%c0_44, %c0_45] : memref<8x128xf32, #tpu.memory_space<vmem>>, vector<8x128xf32>
      %140 = vector.broadcast %124 : i32 to vector<8x128xi32>
      %141 = arith.cmpi slt, %138, %140 : vector<8x128xi32>
      %cst_46 = arith.constant 0.000000e+00 : f32
      %142 = vector.broadcast %cst_46 : f32 to vector<8x128xf32>
      %143 = arith.select %141, %119, %142 : vector<8x128xi1>, vector<8x128xf32>
      %144 = arith.addf %139, %143 : vector<8x128xf32>
      %c0_47 = arith.constant 0 : index
      %c0_48 = arith.constant 0 : index
      %145 = vector.load %arg5[%c0_47, %c0_48] : memref<8x128xf32, #tpu.memory_space<vmem>>, vector<8x128xf32>
      tpu.vector_store %arg5[%c0_47, %c0_48], %144 {strides = array<i32>} : memref<8x128xf32, #tpu.memory_space<vmem>>, vector<8x128xf32>,
    } else {
    }
    %c0_i32_42 = arith.constant 0 : i32
    %131 = arith.cmpi eq, %arg1, %c0_i32_42 : i32
    %132 = arith.extui %131 : i1 to i32
    %c0_i32_43 = arith.constant 0 : i32
    %133 = arith.cmpi ne, %132, %c0_i32_43 : i32
    scf.if %133 {
      %c0_44 = arith.constant 0 : index
      %c0_45 = arith.constant 0 : index
      %134 = vector.load %arg5[%c0_44, %c0_45] : memref<8x128xf32, #tpu.memory_space<vmem>>, vector<8x128xf32>
      %135 = vector.shape_cast %134 : vector<8x128xf32> to vector<1x8x128xf32>
      %cst_46 = arith.constant dense<0.000000e+00> : vector<1xf32>
      %136 = vector.multi_reduction <add>, %135, %cst_46 [1, 2] : vector<1x8x128xf32> to vector<1xf32>
      %137 = vector.shape_cast %136 : vector<1xf32> to vector<1x1x1xf32>
      %138 = vector.extract %137[0, 0, 0] : f32 from vector<1x1x1xf32>
      %139 = vector.broadcast %138 : f32 to vector<1x1x1xf32>
      %c0_47 = arith.constant 0 : index
      %c0_48 = arith.constant 0 : index
      %c0_49 = arith.constant 0 : index
      %140 = vector.load %arg4[%c0_47, %c0_48, %c0_49] : memref<1x1x1xf32, #tpu.memory_space<vmem>>, vector<1x1x1xf32>
      tpu.vector_store %arg4[%c0_47, %c0_48, %c0_49], %139 {strides = array<i32>} : memref<1x1x1xf32, #tpu.memory_space<vmem>>, vector<1x1x1xf32>,
    } else {
    }
    return
  }
  func.func @transform_0(%arg0: i32, %arg1: i32, %arg2: memref<1xi32, #tpu.memory_space<smem>>) -> (i32, i32, i32) {
    %c1_i32 = arith.constant 1 : i32
    %0 = arith.muli %arg0, %c1_i32 : i32
    %1 = arith.addi %0, %arg1 : i32
    %c0_i32 = arith.constant 0 : i32
    %c0_i32_0 = arith.constant 0 : i32
    %c0_i32_1 = arith.constant 0 : i32
    return %c0_i32, %1, %c0_i32_0 : i32, i32, i32
  }
  func.func @transform_1(%arg0: i32, %arg1: i32, %arg2: memref<1xi32, #tpu.memory_space<smem>>) -> (i32, i32, i32) {
    %c0_i32 = arith.constant 0 : i32
    %c0_i32_0 = arith.constant 0 : i32
    %c0_i32_1 = arith.constant 0 : i32
    return %arg0, %c0_i32, %c0_i32_0 : i32, i32, i32
  }
}

</mosaic_0001>

<bundles_post_ra>
// kernel: tpu_custom_call.1
= control target key start
LH: loop header
LB: loop body
LE: loop exit
PB: predicated region body
PF: predicated region fallthrough
CT: control target
= control target key end

     0   :  { %8 = vsyncpa [#allocation6], 0  ;;  %s366_s0 = inlined_call_operand.<no memory space> [shape: s32[1], index: 0, kind: input, shape index: {}]   ;;  %s367_s1 = inlined_call_operand.hbm [shape: f32[12,8,128], index: 1, kind: input, shape index: {}]   ;;  %s368_s2 = inlined_call_operand.hbm [shape: f32[1,1,1], index: 2, kind: output, shape index: {}]  }
   0x1   :  { %9 = vsyncpa [#allocation7], 0  ;;  %s283_s9 = smov [#allocation5]  }
   0x2   :  { %s18_s10 = sshll.u32 %s283_s9, 4  ;;  %s19_s10 = int_to_ptr.vmem [resolvable:$true] %s18_s10 }
   0x3   :  { %s247_s11 = scalar_lea.vmem %s19_s10, 1536  ;;  %p252_p1 = scmp.lt.s32.totalorder %s19_s10, %s19_s10 }
   0x4   :  { %p248_p0 = scmp.ne.s32.totalorder %s19_s10, %s247_s11  ;;  %p253_p2 = scmp.lt.s32.totalorder %s247_s11, %s247_s11 }
   0x6   :  { %p254_p3 = por %p253_p2, %p252_p1 }
   0x8   :  { %p255_p4 = pnand %p254_p3, %p248_p0 }
   0xa   :  { %258 = shalt.err (!%p255_p4)
}
   0xb   :  { %s284_s12 = smov 128   ;;  %s285_s13 = smov 8  }
   0xc   :  { %24 = dma.hbm_to_vmem [thread:$0]  %s367_s1, 1536, %s19_s10, [#allocation6], %s284_s12, %s284_s12, %s285_s13  }
   0xd   :  { %279 = dma.done.wait [#allocation6], 1536  }
   0xe   :  { %280 = vsyncadd [#allocation6], 4294965760  ;;  %v286_v0 = vmov 0.0   ;;  %v34_v1 = vld [vmem:[#allocation5] sm:$0xff]  ;;  %v36_v2 = vld [vmem:[#allocation5 + $0x8] sm:$0xff]  ;;  %p216_p5 = scmp.lt.s32.totalorder %s366_s0, 1024 }
   0xf   :  { %33 = vst [vmem:[#allocation2] sm:$0xff] %v286_v0  ;;  %v38_v3 = vld [vmem:[#allocation5 + $0x10] sm:$0xff]  ;;  %v40_v4 = vld [vmem:[#allocation5 + $0x18] sm:$0xff]  ;;  %v42_v5 = vld [vmem:[#allocation5 + $0x20] sm:$0xff] }
  0x10   :  { %v44_v6 = vld [vmem:[#allocation5 + $0x28] sm:$0xff]  ;;  %v46_v7 = vld [vmem:[#allocation5 + $0x30] sm:$0xff]  ;;  %v48_v8 = vld [vmem:[#allocation5 + $0x38] sm:$0xff]  ;;  %v57_v10 = vsub.f32 %v40_v4, %v34_v1  ;;  %v58_v11 = vsub.f32 %v42_v5, %v36_v2 }
  0x11   :  { %v50_v9 = vld [vmem:[#allocation5 + $0x40] sm:$0xff]  ;;  %v59_v12 = vsub.f32 %v44_v6, %v38_v3  ;;  %v52_v13 = vld [vmem:[#allocation5 + $0x48] sm:$0xff]  ;;  %v54_v14 = vld [vmem:[#allocation5 + $0x50] sm:$0xff]  ;;  %v306_v16 = vsub.f32 %v46_v7, %v34_v1  ;;  %v308_v17 = vsub.f32 %v48_v8, %v36_v2 }
  0x12   :  { %v56_v15 = vld [vmem:[#allocation5 + $0x58] sm:$0xff]  ;;  %v310_v18 = vsub.f32 %v50_v9, %v38_v3  ;;  %v312_v19 = vsub.f32 %v52_v13, %v34_v1  ;;  %v314_v20 = vsub.f32 %v54_v14, %v36_v2  ;;  %v66_v22 = vmul.f32 %v57_v10, %v57_v10 }
  0x13   :  { %v316_v21 = vsub.f32 %v56_v15, %v38_v3  ;;  %v67_v23 = vmul.f32 %v58_v11, %v58_v11  ;;  %v69_v24 = vmul.f32 %v59_v12, %v59_v12  ;;  %v71_v25 = vmul.f32 %v306_v16, %v306_v16 }
  0x14   :  { %v72_v26 = vmul.f32 %v308_v17, %v308_v17  ;;  %v74_v27 = vmul.f32 %v310_v18, %v310_v18  ;;  %v76_v28 = vmul.f32 %v312_v19, %v312_v19  ;;  %v77_v29 = vmul.f32 %v314_v20, %v314_v20 }
  0x15   :  { %v79_v30 = vmul.f32 %v316_v21, %v316_v21  ;;  %v68_v31 = vadd.f32 %v67_v23, %v66_v22  ;;  %v81_v42 = vmul.f32 %v306_v16, %v57_v10  ;;  %v82_v43 = vmul.f32 %v308_v17, %v58_v11 }
  0x16   :  { %v73_v32 = vadd.f32 %v72_v26, %v71_v25  ;;  %v78_v33 = vadd.f32 %v77_v29, %v76_v28  ;;  %v86_v44 = vmul.f32 %v312_v19, %v57_v10  ;;  %v87_v45 = vmul.f32 %v314_v20, %v58_v11 }
  0x17   :  { %v70_v34 = vadd.f32 %v69_v24, %v68_v31  ;;  %v83_v46 = vadd.f32 %v82_v43, %v81_v42  ;;  %v84_v47 = vmul.f32 %v310_v18, %v59_v12  ;;  %v89_v49 = vmul.f32 %v316_v21, %v59_v12 }
  0x18   :  { %v75_v35 = vadd.f32 %v74_v27, %v73_v32  ;;  %v80_v36 = vadd.f32 %v79_v30, %v78_v33  ;;  %v88_v48 = vadd.f32 %v87_v45, %v86_v44 }
  0x19   :  { %v91_v37 = vadd.f32 1e-06, %v70_v34  ;;  %v85_v50 = vadd.f32 %v84_v47, %v83_v46 }
  0x1a   :  { %v330_v38 = vadd.f32 1e-06, %v75_v35  ;;  %v332_v39 = vadd.f32 1e-06, %v80_v36  ;;  %v90_v51 = vadd.f32 %v89_v49, %v88_v48 }
  0x1b   :  { %225 = vrcp.f32 %v91_v37 }
  0x1c   :  { %v94_v40 = vmul.f32 %v330_v38, %v91_v37  ;;  %v105_v41 = vmul.f32 %v332_v39, %v91_v37 }
  0x1e   :  { %227 = vrsqrt.f32 %v94_v40  ;;  %vm97_vm0 = vcmp.eq.f32.partialorder %v94_v40, inf  ;;  %vm99_vm1 = vcmp.eq.f32.partialorder %v94_v40, 0.0  ;;  %v100_v56 = vand.u32 2147483648, %v94_v40 }
  0x1f   :  { %229 = vrsqrt.f32 %v105_v41  ;;  %vm108_vm2 = vcmp.eq.f32.partialorder %v105_v41, inf  ;;  %vm110_vm3 = vcmp.eq.f32.partialorder %v105_v41, 0.0  ;;  %v111_v57 = vand.u32 2147483648, %v105_v41 }
  0x28   :  { %v226_v52 = vpop.eup %225 }
  0x29   :  { %v124_v53 = vmul.f32 %v226_v52, %v85_v50  ;;  %v125_v54 = vmul.f32 %v226_v52, %v90_v51 }
  0x2b   :  { %v228_v55 = vpop.eup %227  ;;  %v126_v60 = vmul.f32 %v124_v53, %v57_v10  ;;  %v128_v61 = vmul.f32 %v124_v53, %v58_v11  ;;  %v130_v62 = vmul.f32 %v124_v53, %v59_v12  ;;  %v132_v0 = vmul.f32 %v125_v54, %v57_v10 }
  0x2c   :  { %v230_v58 = vpop.eup %229  ;;  %v96_v59 = vmul.f32 %v228_v55, %v94_v40  ;;  %v134_v1 = vmul.f32 %v125_v54, %v58_v11  ;;  %v136_v2 = vmul.f32 %v125_v54, %v59_v12 }
  0x2d   :  { %v107_v63 = vmul.f32 %v230_v58, %v105_v41  ;;  %v127_v4 = vsub.f32 %v306_v16, %v126_v60  ;;  %v129_v5 = vsub.f32 %v308_v17, %v128_v61  ;;  %v131_v6 = vsub.f32 %v310_v18, %v130_v62 }
  0x2e   :  { %v98_v3 = vsel %vm97_vm0, %v94_v40, %v96_v59  ;;  %v133_v9 = vsub.f32 %v312_v19, %v132_v0  ;;  %v135_v13 = vsub.f32 %v314_v20, %v134_v1  ;;  %v137_v11 = vsub.f32 %v316_v21, %v136_v2 }
  0x2f   :  { %v101_v7 = vsel %vm99_vm1, %v100_v56, %v98_v3  ;;  %v109_v8 = vsel %vm108_vm2, %v105_v41, %v107_v63 }
  0x30   :  { %v102_v14 = vadd.f32 1e-06, %v101_v7  ;;  %v112_v10 = vsel %vm110_vm3, %v111_v57, %v109_v8  ;;  %v138_v15 = vmul.f32 %v133_v9, %v127_v4  ;;  %v139_v16 = vmul.f32 %v135_v13, %v129_v5 }
  0x31   :  { %v113_v12 = vadd.f32 1e-06, %v112_v10  ;;  %v141_v17 = vmul.f32 %v137_v11, %v131_v6 }
  0x32   :  { %231 = vrcp.f32 %v102_v14  ;;  %v140_v18 = vadd.f32 %v139_v16, %v138_v15 }
  0x33   :  { %233 = vrcp.f32 %v113_v12 }
  0x34   :  { %v142_v22 = vadd.f32 %v141_v17, %v140_v18 }
  0x3f   :  { %v232_v23 = vpop.eup %231 }
  0x40   :  { %v234_v24 = vpop.eup %233  ;;  %v104_v25 = vmul.f32 %v232_v23, %v85_v50 }
  0x41   :  { %v115_v26 = vmul.f32 %v234_v24, %v90_v51 }
  0x42   :  { %v116_v19 = vmul.f32 %v104_v25, %v104_v25 }
  0x43   :  { %v119_v27 = vmul.f32 %v115_v26, %v115_v26 }
  0x44   :  { %v117_v20 = vsub.f32 1.0, %v116_v19 }
  0x45   :  { %v120_v28 = vsub.f32 1.0, %v119_v27 }
  0x46   :  { %v118_v29 = vadd.f32 1e-06, %v117_v20 }
  0x47   :  { %v121_v30 = vadd.f32 1e-06, %v120_v28 }
  0x48   :  { %v143_v21 = vmul.f32 %v118_v29, %v330_v38 }
  0x4a   :  { %v144_v31 = vmul.f32 %v143_v21, %v332_v39 }
  0x4c   :  { %v145_v32 = vmul.f32 %v144_v31, %v121_v30 }
  0x4e   :  { %235 = vrsqrt.f32 %v145_v32  ;;  %vm148_vm4 = vcmp.eq.f32.partialorder %v145_v32, inf  ;;  %v151_v34 = vand.u32 2147483648, %v145_v32  ;;  %vm150_vm5 = vcmp.eq.f32.partialorder %v145_v32, 0.0 }
  0x5b   :  { %v236_v33 = vpop.eup %235 }
  0x5c   :  { %v147_v35 = vmul.f32 %v236_v33, %v145_v32 }
  0x5e   :  { %v149_v36 = vsel %vm148_vm4, %v145_v32, %v147_v35 }
  0x5f   :  { %v152_v37 = vsel %vm150_vm5, %v151_v34, %v149_v36 }
  0x60   :  { %v153_v40 = vadd.f32 1e-06, %v152_v37 }
  0x62   :  { %237 = vrcp.f32 %v153_v40 }
  0x6f   :  { %v238_v41 = vpop.eup %237 }
  0x70   :  { %v155_v42 = vmul.f32 %v238_v41, %v142_v22  ;;  %165 = sbr.rel (%p216_p5) target bundleno = 121 (0x79), region = 17 }
  0x72   :  { %v156_v43 = vadd.f32 1.0, %v155_v42 }
  0x74   :  { %v157_v44 = vmul.f32 %v156_v43, %v156_v43 }
  0x75   :  { %v166_v38 = vld [vmem:[#allocation2] sm:$0xff] }
  0x76   :  { %v167_v39 = vadd.f32 %v166_v38, %v157_v44 }
  0x78   :  { %168 = vst [vmem:[#allocation2] sm:$0xff] %v167_v39 }
  0x79 PF:  { %p217_p6 = scmp.ge.s32.totalorder %s366_s0, 1024 }
  0x7b   :  { %172 = sbr.rel (%p217_p6) target bundleno = 141 (0x8d), region = 21 }
  0x80   :  { %v173_v45 = vlaneseq  ;;  %v180_v49 = vstv %s366_s0  ;;  %v179_v51 = vld [vmem:[#allocation2] sm:$0xff] }
  0x82   :  { %v174_v46 = vshrl.u32 %v173_v45, 7  ;;  %v176_v47 = vand.u32 127, %v173_v45 }
  0x84   :  { %v177_v48 = vmul.u32 128, %v174_v46 }
  0x86   :  { %v178_v50 = vadd.s32 %v177_v48, %v176_v47 }
  0x88   :  { %vm181_vm6 = vcmp.lt.s32.totalorder %v178_v50, %v180_v49 }
  0x89   :  { %v182_v52 = vsel %vm181_vm6, %v157_v44, 0.0 }
  0x8a   :  { %v183_v53 = vadd.f32 %v182_v52, %v179_v51 }
  0x8c   :  { %184 = vst [vmem:[#allocation2] sm:$0xff] %v183_v53 }
  0x8d PF:  { %s287_s21 = smov [#allocation8]   ;;  %vm199_vm7 = vcmask 0  }
  0x8e   :  { %s207_s22 = sshll.u32 %s287_s21, 4  ;;  %s208_s22 = int_to_ptr.vmem [resolvable:$true] %s207_s22 }
  0x8f   :  { %s259_s23 = scalar_lea.vmem %s208_s22, 16  ;;  %s263_s24 = scalar_lea.vmem %s208_s22, 32 }
  0x90   :  { %p260_p7 = scmp.ne.s32.totalorder %s208_s22, %s259_s23  ;;  %p264_p8 = scmp.lt.s32.totalorder %s208_s22, %s208_s22 }
  0x91   :  { %p265_p9 = scmp.lt.s32.totalorder %s263_s24, %s259_s23 }
  0x93   :  { %v188_v54 = vld [vmem:[#allocation2] sm:$0xff]  ;;  %p266_p10 = por %p265_p9, %p264_p8 }
  0x94   :  { %189 = vadd.xlane.f32.xlu0 %v188_v54 }
  0x95   :  { %p267_p11 = pnand %p266_p10, %p260_p7 }
 0x11d   :  { %v190_v55 = vpop.xlane.xlu0 %189 }
 0x11e   :  { %v191_v56 = vrot.slane %v190_v55, 4 }
 0x120   :  { %v192_v57 = vadd.f32 %v191_v56, %v190_v55 }
 0x122   :  { %v193_v58 = vrot.slane %v192_v57, 2 }
 0x124   :  { %v194_v59 = vadd.f32 %v193_v58, %v192_v57 }
 0x126   :  { %v195_v60 = vrot.slane %v194_v59, 1 }
 0x128   :  { %v196_v61 = vadd.f32 %v195_v60, %v194_v59 }
 0x12a   :  { %218 = vpush %v196_v61 }
 0x15b   :  { %s219_s0 = spop %218 }
 0x15c   :  { %v198_v62 = vstv %s219_s0 }
 0x15d   :  { %200 = vst.msk [vmem:[#allocation8] sm:$0x1] %vm199_vm7, %v198_v62 }
 0x15e   :  { %270 = shalt.err (!%p267_p11)
}
 0x15f   :  { %210 = dma.vmem_to_hbm [thread:$0]  %s208_s22, 16, %s368_s2, [#allocation7]  }
 0x160   :  { %281 = dma.done.wait [#allocation7], 16  }
 0x161   :  { %282 = vsyncadd [#allocation7], 4294967280 }
 0x162   :  { %214 = vsyncpa [#allocation6], 1 }
 0x163   :  { %215 = vsyncpa [#allocation7], 1 }

</bundles_post_ra>
